<compile_context>
chip_gen: v7x
topology: tpu7x:2x2x1
jax: 0.10.0
libtpu: 0.0.40
codegen_flags: <defaults>
</compile_context>

<pallas_src>
import jax
import jax.numpy as jnp
from jax.experimental import pallas as pl
from jax.experimental.pallas import tpu as pltpu

EPS = 1e-5
_VMEM_LIMIT = 32 * 1024 * 1024  # safe on v5e/v6e (128 MiB) and v7x (64 MiB)


def _stats_kernel(x_ref, sum_ref, sq_ref):
    """Accumulate per-lane sum and sum-of-squares across row tiles."""
    @pl.when(pl.program_id(0) == 0)
    def _init():
        sum_ref[...] = jnp.zeros_like(sum_ref)
        sq_ref[...] = jnp.zeros_like(sq_ref)

    x = x_ref[...].astype(jnp.float32)          # (tr, Cp)
    sum_ref[...] += jnp.sum(x, axis=0, keepdims=True)
    sq_ref[...] += jnp.sum(x * x, axis=0, keepdims=True)


def _norm_kernel(x_ref, scale_ref, shift_ref, o_ref):
    """Streaming normalize: y = x * scale + shift (affine pre-folded)."""
    x = x_ref[...].astype(jnp.float32)
    o_ref[...] = (x * scale_ref[...] + shift_ref[...]).astype(o_ref.dtype)


def batchnorm_layer(x, gamma, beta, eps=EPS):
    """x: (B, L, C); gamma, beta: (C,). Returns (B, L, C) normalized with batch stats."""
    B, L, C = x.shape
    N = B * L
    dtype = x.dtype
    itemsize = jnp.dtype(dtype).itemsize

    # ---- Lane packing: fold `pack` consecutive rows into the 128-lane dim. ----
    pack = (128 // C) if (0 < C <= 128 and 128 % C == 0) else 1
    Cp = C * pack

    rows = -(-N // pack)                              # ceil(N / pack)
    tr = min(1024, ((rows + 7) // 8) * 8)             # row tile, multiple of 8
    rows_pad = ((rows + tr - 1) // tr) * tr
    n_tiles = rows_pad // tr
    N_pad = rows_pad * pack

    x2d = x.reshape(N, C)
    if N_pad != N:
        # Zero padding is stats-neutral (contributes 0 to sum / sumsq; we divide by true N).
        x2d = jnp.concatenate(
            [x2d, jnp.zeros((N_pad - N, C), dtype=dtype)], axis=0)
    xp = x2d.reshape(rows_pad, Cp)                    # free, layout-preserving reshape

    # ---- Phase 1: per-lane sum / sum-of-squares, accumulated across row tiles. ----
    lane_sum, lane_sq = pl.pallas_call(
        _stats_kernel,
        out_shape=(jax.ShapeDtypeStruct((1, Cp), jnp.float32),
                   jax.ShapeDtypeStruct((1, Cp), jnp.float32)),
        grid=(n_tiles,),
        in_specs=[pl.BlockSpec((tr, Cp), lambda i: (i, 0))],
        out_specs=(pl.BlockSpec((1, Cp), lambda i: (0, 0)),
                   pl.BlockSpec((1, Cp), lambda i: (0, 0))),
        compiler_params=pltpu.CompilerParams(
            dimension_semantics=("arbitrary",),       # resident accumulator outputs
            vmem_limit_bytes=_VMEM_LIMIT),
        cost_estimate=pl.CostEstimate(
            flops=3 * rows_pad * Cp,
            transcendentals=0,
            bytes_accessed=rows_pad * Cp * itemsize + 2 * Cp * 4),
    )(xp)

    # ---- Fold stats + affine into per-channel scale / shift (tiny, pure JAX). ----
    sum_c = lane_sum.reshape(pack, C).sum(axis=0)     # combine lane groups -> per-channel
    sq_c = lane_sq.reshape(pack, C).sum(axis=0)
    mean = sum_c / N
    var = jnp.maximum(sq_c / N - mean * mean, 0.0)    # biased variance (PyTorch forward)
    inv = jax.lax.rsqrt(var + eps)
    scale_c = gamma.astype(jnp.float32) * inv
    shift_c = beta.astype(jnp.float32) - mean * scale_c
    scale = jnp.tile(scale_c, pack).reshape(1, Cp)    # broadcast across lane groups
    shift = jnp.tile(shift_c, pack).reshape(1, Cp)

    # ---- Phase 2: streaming normalize  y = x * scale + shift. ----
    out_p = pl.pallas_call(
        _norm_kernel,
        out_shape=jax.ShapeDtypeStruct((rows_pad, Cp), dtype),
        grid=(n_tiles,),
        in_specs=[pl.BlockSpec((tr, Cp), lambda i: (i, 0)),
                  pl.BlockSpec((1, Cp), lambda i: (0, 0)),
                  pl.BlockSpec((1, Cp), lambda i: (0, 0))],
        out_specs=pl.BlockSpec((tr, Cp), lambda i: (i, 0)),
        compiler_params=pltpu.CompilerParams(
            dimension_semantics=("parallel",),        # independent tiles (megacore on v7x)
            vmem_limit_bytes=_VMEM_LIMIT),
        cost_estimate=pl.CostEstimate(
            flops=2 * rows_pad * Cp,
            transcendentals=0,
            bytes_accessed=2 * rows_pad * Cp * itemsize + 2 * Cp * 4),
    )(xp, scale, shift)

    out2d = out_p.reshape(N_pad, C)[:N]
    return out2d.reshape(B, L, C)


def _reference(x, gamma, beta, eps=EPS):
    # Pure-JAX reference of BatchNorm1d training-mode forward (batch stats).
    xf = x.astype(jnp.float32)
    mean = jnp.mean(xf, axis=(0, 1), keepdims=True)
    var = jnp.mean((xf - mean) ** 2, axis=(0, 1), keepdims=True)
    y = (xf - mean) / jnp.sqrt(var + eps) * gamma + beta
    return y.astype(x.dtype)


if __name__ == "__main__":
    key = jax.random.PRNGKey(0)
    kx, kg, kb, kx2 = jax.random.split(key, 4)

    # --- small shape consistent with the module: (batch, seq, features) ---
    B, L, C = 2, 8, 32
    x = jax.random.normal(kx, (B, L, C), dtype=jnp.float32)
    gamma = 1.0 + 0.1 * jax.random.normal(kg, (C,), dtype=jnp.float32)
    beta = 0.1 * jax.random.normal(kb, (C,), dtype=jnp.float32)

    out = batchnorm_layer(x, gamma, beta)
    jax.block_until_ready(out)
    ref = _reference(x, gamma, beta)
    assert out.shape == (B, L, C)
    assert jnp.allclose(out, ref, atol=1e-5, rtol=1e-5), "mismatch vs reference (small)"

    # --- secondary check exercising the multi-tile accumulator + padding path ---
    B2, L2 = 4, 2500                                  # rows = 2500 -> 3 tiles of 1024
    x2 = jax.random.normal(kx2, (B2, L2, C), dtype=jnp.float32)
    out2 = batchnorm_layer(x2, gamma, beta)
    jax.block_until_ready(out2)
    ref2 = _reference(x2, gamma, beta)
    assert out2.shape == (B2, L2, C)
    assert jnp.allclose(out2, ref2, atol=1e-4, rtol=1e-4), "mismatch vs reference (tiled)"

    print("KERNEL_OK")
</pallas_src>

<mosaic_0001>
module attributes {stable_mosaic.version = 11 : i64} {
  func.func @_stats_kernel(%arg0: i32, %arg1: memref<8x128xf32, #tpu.memory_space<vmem>>, %arg2: memref<1x128xf32, #tpu.memory_space<vmem>>, %arg3: memref<1x128xf32, #tpu.memory_space<vmem>>) attributes {dimension_semantics = [#tpu.dimension_semantics<arbitrary>], iteration_bounds = array<i64: 1>, scalar_prefetch = 0 : i64, scratch_operands = 0 : i64, tpu.core_type = #tpu.core_type<tc>, window_params = [{transform_indices = @transform_0, window_bounds = array<i64: 8, 128>}, {pipeline_mode = #tpu.pipeline_mode<synchronous>, transform_indices = @transform_1, window_bounds = array<i64: 1, 128>}, {pipeline_mode = #tpu.pipeline_mode<synchronous>, transform_indices = @transform_2, window_bounds = array<i64: 1, 128>}]} {
    %c0_i32 = arith.constant 0 : i32
    %0 = arith.cmpi eq, %arg0, %c0_i32 : i32
    %1 = arith.extui %0 : i1 to i32
    %c0_i32_0 = arith.constant 0 : i32
    %2 = arith.cmpi ne, %1, %c0_i32_0 : i32
    scf.if %2 {
      %cst_11 = arith.constant 0.000000e+00 : f32
      %15 = vector.broadcast %cst_11 : f32 to vector<1x128xf32>
      %c0_12 = arith.constant 0 : index
      %c0_13 = arith.constant 0 : index
      %16 = vector.load %arg2[%c0_12, %c0_13] : memref<1x128xf32, #tpu.memory_space<vmem>>, vector<1x128xf32>
      tpu.vector_store %arg2[%c0_12, %c0_13], %15 {strides = array<i32>} : memref<1x128xf32, #tpu.memory_space<vmem>>, vector<1x128xf32>,
      %cst_14 = arith.constant 0.000000e+00 : f32
      %17 = vector.broadcast %cst_14 : f32 to vector<1x128xf32>
      %c0_15 = arith.constant 0 : index
      %c0_16 = arith.constant 0 : index
      %18 = vector.load %arg3[%c0_15, %c0_16] : memref<1x128xf32, #tpu.memory_space<vmem>>, vector<1x128xf32>
      tpu.vector_store %arg3[%c0_15, %c0_16], %17 {strides = array<i32>} : memref<1x128xf32, #tpu.memory_space<vmem>>, vector<1x128xf32>,
    } else {
    }
    %c0 = arith.constant 0 : index
    %c0_1 = arith.constant 0 : index
    %3 = vector.load %arg1[%c0, %c0_1] : memref<8x128xf32, #tpu.memory_space<vmem>>, vector<8x128xf32>
    %c0_2 = arith.constant 0 : index
    %c0_3 = arith.constant 0 : index
    %4 = vector.load %arg2[%c0_2, %c0_3] : memref<1x128xf32, #tpu.memory_space<vmem>>, vector<1x128xf32>
    %cst = arith.constant dense<0.000000e+00> : vector<128xf32>
    %5 = vector.multi_reduction <add>, %3, %cst [0] : vector<8x128xf32> to vector<128xf32>
    %6 = vector.shape_cast %5 : vector<128xf32> to vector<1x128xf32>
    %7 = arith.addf %4, %6 : vector<1x128xf32>
    %c0_4 = arith.constant 0 : index
    %c0_5 = arith.constant 0 : index
    %8 = vector.load %arg2[%c0_4, %c0_5] : memref<1x128xf32, #tpu.memory_space<vmem>>, vector<1x128xf32>
    tpu.vector_store %arg2[%c0_4, %c0_5], %7 {strides = array<i32>} : memref<1x128xf32, #tpu.memory_space<vmem>>, vector<1x128xf32>,
    %c0_6 = arith.constant 0 : index
    %c0_7 = arith.constant 0 : index
    %9 = vector.load %arg3[%c0_6, %c0_7] : memref<1x128xf32, #tpu.memory_space<vmem>>, vector<1x128xf32>
    %10 = arith.mulf %3, %3 : vector<8x128xf32>
    %cst_8 = arith.constant dense<0.000000e+00> : vector<128xf32>
    %11 = vector.multi_reduction <add>, %10, %cst_8 [0] : vector<8x128xf32> to vector<128xf32>
    %12 = vector.shape_cast %11 : vector<128xf32> to vector<1x128xf32>
    %13 = arith.addf %9, %12 : vector<1x128xf32>
    %c0_9 = arith.constant 0 : index
    %c0_10 = arith.constant 0 : index
    %14 = vector.load %arg3[%c0_9, %c0_10] : memref<1x128xf32, #tpu.memory_space<vmem>>, vector<1x128xf32>
    tpu.vector_store %arg3[%c0_9, %c0_10], %13 {strides = array<i32>} : memref<1x128xf32, #tpu.memory_space<vmem>>, vector<1x128xf32>,
    return
  }
  func.func @transform_0(%arg0: i32) -> (i32, i32) {
    %c0_i32 = arith.constant 0 : i32
    %c0_i32_0 = arith.constant 0 : i32
    return %arg0, %c0_i32 : i32, i32
  }
  func.func @transform_1(%arg0: i32) -> (i32, i32) {
    %c0_i32 = arith.constant 0 : i32
    %c0_i32_0 = arith.constant 0 : i32
    %c0_i32_1 = arith.constant 0 : i32
    return %c0_i32, %c0_i32_0 : i32, i32
  }
  func.func @transform_2(%arg0: i32) -> (i32, i32) {
    %c0_i32 = arith.constant 0 : i32
    %c0_i32_0 = arith.constant 0 : i32
    %c0_i32_1 = arith.constant 0 : i32
    return %c0_i32, %c0_i32_0 : i32, i32
  }
}

</mosaic_0001>

<bundles_post_ra>
// kernel: tpu_custom_call.1
= control target key start
LH: loop header
LB: loop body
LE: loop exit
PB: predicated region body
PF: predicated region fallthrough
CT: control target
= control target key end

     0   :  { %8 = vsyncpa [#allocation3], 0  ;;  %s218_s0 = inlined_call_operand.hbm [shape: f32[8,128], index: 0, kind: input, shape index: {}]   ;;  %s219_s1 = inlined_call_operand.hbm [shape: f32[1,128], index: 1, kind: output, shape index: {0}]   ;;  %s220_s2 = inlined_call_operand.hbm [shape: f32[1,128], index: 2, kind: output, shape index: {1}]  }
   0x1   :  { %9 = vsyncpa [#allocation4], 0 }
   0x2   :  { %10 = vsyncpa [#allocation7], 0  ;;  %s155_s9 = smov [#allocation2]   ;;  %s83_s13 = scalar_lea.hbm %s218_s0, 128 }
   0x3   :  { %s17_s10 = sshll.u32 %s155_s9, 4  ;;  %p84_p0 = scmp.ne.s32.totalorder %s218_s0, %s83_s13  ;;  %s18_s10 = int_to_ptr.vmem [resolvable:$true] %s17_s10 }
   0x4   :  { %p87_p1 = scmp.lt.u32.totalorder %s83_s13, %s218_s0 }
   0x6   :  { %p89_p2 = pnand %p87_p1, %p84_p0 }
   0x8   :  { %92 = shalt.err (!%p89_p2)
}
   0x9   :  { %s93_s18 = scalar_lea.vmem %s18_s10, 128  ;;  %p98_p4 = scmp.lt.s32.totalorder %s18_s10, %s18_s10 }
   0xa   :  { %p94_p3 = scmp.ne.s32.totalorder %s18_s10, %s93_s18  ;;  %p99_p5 = scmp.lt.s32.totalorder %s93_s18, %s93_s18 }
   0xc   :  { %p100_p6 = por %p99_p5, %p98_p4 }
   0xe   :  { %p101_p7 = pnand %p100_p6, %p94_p3 }
  0x10   :  { %104 = shalt.err (!%p101_p7)
}
  0x11   :  { %20 = dma.hbm_to_vmem [thread:$0]  %s218_s0, 128, %s18_s10, [#allocation3]  }
  0x12   :  { %149 = dma.done.wait [#allocation3], 128  }
  0x13   :  { %150 = vsyncadd [#allocation3], 4294967168  ;;  %v156_v0 = vmov 0.0   ;;  %v30_v1 = vld [vmem:[#allocation2] sm:$0xff]  ;;  %s157_s21 = smov [#allocation5]   ;;  %s158_s0 = smov [#allocation6]  }
  0x14   :  { %28 = vst [vmem:[#allocation5] sm:$0x1] %v156_v0  ;;  %29 = vst [vmem:[#allocation6] sm:$0x1] %v156_v0  ;;  %v32_v2 = vrot.slane %v30_v1, 4  ;;  %v41_v3 = vmul.f32 %v30_v1, %v30_v1  ;;  %s56_s22 = sshll.u32 %s157_s21, 4  ;;  %s57_s22 = int_to_ptr.vmem [resolvable:$true] %s56_s22 }
  0x15   :  { %s66_s23 = sshll.u32 %s158_s0, 4  ;;  %s105_s24 = scalar_lea.vmem %s57_s22, 16  ;;  %s186_s23 = int_to_ptr.vmem [resolvable:$true] %s66_s23 }
  0x16   :  { %v33_v4 = vadd.f32 %v32_v2, %v30_v1  ;;  %v42_v5 = vrot.slane %v41_v3, 4  ;;  %p106_p8 = scmp.ne.s32.totalorder %s57_s22, %s105_s24  ;;  %s109_s25 = scalar_lea.vmem %s57_s22, 32 }
  0x17   :  { %p110_p9 = scmp.lt.s32.totalorder %s57_s22, %s57_s22  ;;  %p111_p10 = scmp.lt.s32.totalorder %s109_s25, %s105_s24 }
  0x18   :  { %v34_v6 = vrot.slane %v33_v4, 2  ;;  %v43_v7 = vadd.f32 %v42_v5, %v41_v3 }
  0x19   :  { %p112_p11 = por %p111_p10, %p110_p9 }
  0x1a   :  { %v35_v8 = vadd.f32 %v34_v6, %v33_v4  ;;  %v44_v9 = vrot.slane %v43_v7, 2 }
  0x1b   :  { %v31_v12 = vld [vmem:[#allocation5] sm:$0x1]  ;;  %v40_v15 = vld [vmem:[#allocation6] sm:$0x1]  ;;  %p113_p12 = pnand %p112_p11, %p106_p8 }
  0x1c   :  { %v36_v10 = vrot.slane %v35_v8, 1  ;;  %v45_v11 = vadd.f32 %v44_v9, %v43_v7 }
  0x1e   :  { %v37_v13 = vadd.f32 %v36_v10, %v35_v8  ;;  %v46_v14 = vrot.slane %v45_v11, 1 }
  0x20   :  { %v38_v16 = vadd.f32 %v37_v13, %v31_v12  ;;  %v47_v17 = vadd.f32 %v46_v14, %v45_v11 }
  0x22   :  { %39 = vst [vmem:[#allocation5] sm:$0x1] %v38_v16  ;;  %v48_v18 = vadd.f32 %v47_v17, %v40_v15 }
  0x23   :  { %116 = shalt.err (!%p113_p12)
}
  0x24   :  { %s117_s28 = scalar_lea.hbm %s219_s1, 16 }
  0x25   :  { %p118_p13 = scmp.ne.s32.totalorder %s219_s1, %s117_s28  ;;  %p121_p0 = scmp.lt.u32.totalorder %s117_s28, %s219_s1 }
  0x27   :  { %p123_p1 = pnand %p121_p0, %p118_p13 }
  0x29   :  { %126 = shalt.err (!%p123_p1)
}
  0x2a   :  { %59 = dma.vmem_to_hbm [thread:$0]  %s57_s22, 16, %s219_s1, [#allocation4]   ;;  %49 = vst [vmem:[#allocation6] sm:$0x1] %v48_v18 }
  0x2b   :  { %s127_s7 = scalar_lea.vmem %s186_s23, 16  ;;  %s131_s8 = scalar_lea.vmem %s186_s23, 32 }
  0x2c   :  { %p128_p2 = scmp.ne.s32.totalorder %s186_s23, %s127_s7  ;;  %p132_p3 = scmp.lt.s32.totalorder %s186_s23, %s186_s23 }
  0x2d   :  { %p133_p4 = scmp.lt.s32.totalorder %s131_s8, %s127_s7 }
  0x2f   :  { %p134_p5 = por %p133_p4, %p132_p3 }
  0x31   :  { %p135_p6 = pnand %p134_p5, %p128_p2 }
  0x33   :  { %138 = shalt.err (!%p135_p6)
}
  0x34   :  { %s139_s11 = scalar_lea.hbm %s220_s2, 16 }
  0x35   :  { %p140_p7 = scmp.ne.s32.totalorder %s220_s2, %s139_s11  ;;  %p143_p8 = scmp.lt.u32.totalorder %s139_s11, %s220_s2 }
  0x37   :  { %p145_p9 = pnand %p143_p8, %p140_p7 }
  0x39   :  { %148 = shalt.err (!%p145_p9)
}
  0x3a   :  { %69 = dma.vmem_to_hbm [thread:$0]  %s186_s23, 16, %s220_s2, [#allocation7]  }
  0x3b   :  { %151 = dma.done.wait [#allocation4], 16  }
  0x3c   :  { %152 = vsyncadd [#allocation4], 4294967280 }
  0x3d   :  { %153 = dma.done.wait [#allocation7], 16  }
  0x3e   :  { %154 = vsyncadd [#allocation7], 4294967280 }
  0x3f   :  { %76 = vsyncpa [#allocation3], 1 }
  0x40   :  { %77 = vsyncpa [#allocation4], 1 }
  0x41   :  { %78 = vsyncpa [#allocation7], 1 }

</bundles_post_ra>
